<compile_context>
chip_gen: v7x
topology: tpu7x:2x2x1
jax: 0.10.0
libtpu: 0.0.40
codegen_flags: <defaults>
</compile_context>

<pallas_src>
import jax
import jax.numpy as jnp
from jax.experimental import pallas as pl
from jax.experimental.pallas import tpu as pltpu


def _sigmoid_kernel(x_ref, o_ref):
    x = x_ref[...]
    if x.dtype == jnp.float32 or x.dtype == jnp.bfloat16:
        # Native-dtype path: no cast ops, lower vreg/VMEM-temporary pressure.
        o_ref[...] = jax.nn.sigmoid(x)
    else:
        # f16 / fp8 / other floats: compute the transcendental in f32.
        o_ref[...] = jax.nn.sigmoid(x.astype(jnp.float32)).astype(o_ref.dtype)


def _sigmoid_flat(x_flat: jax.Array, target_tile_bytes: int) -> jax.Array:
    """Sigmoid over a flat array whose length is a multiple of 128."""
    n = x_flat.size
    dtype = x_flat.dtype
    itemsize = jnp.dtype(dtype).itemsize
    # dtype-aware sublane packing: 8 (f32), 16 (bf16/f16), 32 (int8/fp8)
    sub_mult = 8 * max(1, 4 // itemsize)

    # Widest lane-dense last dim that divides n exactly AND keeps the block
    # sublane-dense (rows >= sub_mult -> full vreg occupancy).
    lane = 128
    for w in (8192, 4096, 2048, 1024, 512, 256, 128):
        if n % w == 0 and (n // w) >= sub_mult:
            lane = w
            break
    else:
        # Tiny arrays: fall back to the widest width that divides n.
        for w in (8192, 4096, 2048, 1024, 512, 256, 128):
            if n % w == 0:
                lane = w
                break

    rows = n // lane
    x2d = x_flat.reshape(rows, lane)

    # Row tile sized so each block is ~target_tile_bytes, rounded to the
    # dtype-aware sublane multiple.
    bytes_per_row = lane * itemsize
    tr = max(1, target_tile_bytes // bytes_per_row)
    tr = max(sub_mult, (tr // sub_mult) * sub_mult)

    # Megacore: for arrays bigger than ~2 MiB make sure the (single) parallel
    # grid axis has at least 2, ideally 4, steps so both v7x TensorCores get
    # work instead of the whole array landing on one core as a single block.
    total_bytes = n * itemsize
    if total_bytes > 2 * 1024 * 1024 and rows >= 2 * sub_mult:
        quarter = (rows // 4 // sub_mult) * sub_mult
        half = (rows // 2 // sub_mult) * sub_mult
        cap = quarter if quarter >= sub_mult else half
        tr = min(tr, max(sub_mult, cap))
    if tr >= rows:
        tr = rows  # full-extent block dim is always legal

    grid = (pl.cdiv(rows, tr),)

    # ~2.5x the double-buffered working set (2 in-bufs + 2 out-bufs), clamped:
    # >= 32 MiB (above every chip's scoped default) and <= 48 MiB (headroom
    # under v7x's 64 MiB physical VMEM).
    tile_bytes = tr * lane * itemsize
    vmem_limit = int(min(48 * 1024 * 1024,
                         max(32 * 1024 * 1024, 2.5 * 4 * tile_bytes)))

    out2d = pl.pallas_call(
        _sigmoid_kernel,
        out_shape=jax.ShapeDtypeStruct((rows, lane), dtype),
        grid_spec=pltpu.PrefetchScalarGridSpec(
            num_scalar_prefetch=0,
            grid=grid,
            in_specs=[pl.BlockSpec((tr, lane), lambda i: (i, 0))],
            out_specs=pl.BlockSpec((tr, lane), lambda i: (i, 0)),
        ),
        compiler_params=pltpu.CompilerParams(
            dimension_semantics=("parallel",),
            vmem_limit_bytes=vmem_limit,
        ),
    )(x2d)
    return out2d.reshape(-1)


def pallas_sigmoid(x: jax.Array, *, target_tile_bytes: int = 8 * 1024 * 1024) -> jax.Array:
    """Elementwise sigmoid via a Pallas TPU kernel. Works for any shape."""
    orig_shape = x.shape
    dtype = x.dtype
    n = x.size
    if n == 0:
        return x

    if not jnp.issubdtype(dtype, jnp.floating):
        # TODO(synk): PyTorch's nn.Sigmoid rejects integer tensors; promote via
        # plain JAX instead of truncating inside the kernel.
        return jax.nn.sigmoid(x)

    if n % 128 == 0:
        # Common case: lane-dense slab over the whole array, no pad/slice.
        return _sigmoid_flat(jnp.ravel(x), target_tile_bytes).reshape(orig_shape)

    # Ragged case: kernel on the 128-aligned bulk, plain jnp on the tiny tail.
    # Avoids the full-array pad/concat round trip (~3x HBM traffic) of the
    # previous fallback.
    x_flat = jnp.ravel(x)
    bulk = (n // 128) * 128
    if bulk == 0:
        return jax.nn.sigmoid(x)
    head = _sigmoid_flat(x_flat[:bulk], target_tile_bytes)
    tail = jax.nn.sigmoid(x_flat[bulk:])
    return jnp.concatenate([head, tail]).reshape(orig_shape)


if __name__ == "__main__":
    key = jax.random.PRNGKey(0)
    # NCHW input consistent with the nn.layers test (batch=2, ch=4, 16x16)
    x = jax.random.normal(key, (2, 4, 16, 16), dtype=jnp.float32)

    y = pallas_sigmoid(x)
    y = jax.block_until_ready(y)

    y_ref = jax.nn.sigmoid(x)
    assert y.shape == x.shape and y.dtype == x.dtype
    assert jnp.allclose(y, y_ref, atol=1e-6, rtol=1e-6)

    print("KERNEL_OK")
</pallas_src>

<mosaic_0001>
module attributes {stable_mosaic.version = 11 : i64} {
  func.func @_sigmoid_kernel(%arg0: i32, %arg1: memref<8x256xf32, #tpu.memory_space<vmem>>, %arg2: memref<8x256xf32, #tpu.memory_space<vmem>>) attributes {dimension_semantics = [#tpu.dimension_semantics<parallel>], iteration_bounds = array<i64: 1>, scalar_prefetch = 0 : i64, scratch_operands = 0 : i64, tpu.core_type = #tpu.core_type<tc>, window_params = [{transform_indices = @transform_0, window_bounds = array<i64: 8, 256>}, {transform_indices = @transform_1, window_bounds = array<i64: 8, 256>}]} {
    %c0 = arith.constant 0 : index
    %c0_0 = arith.constant 0 : index
    %0 = vector.load %arg1[%c0, %c0_0] : memref<8x256xf32, #tpu.memory_space<vmem>>, vector<8x256xf32>
    %1 = arith.negf %0 : vector<8x256xf32>
    %2 = math.exp %1 : vector<8x256xf32>
    %cst = arith.constant 1.000000e+00 : f32
    %3 = vector.broadcast %cst : f32 to vector<8x256xf32>
    %4 = arith.addf %3, %2 : vector<8x256xf32>
    %5 = arith.divf %3, %4 : vector<8x256xf32>
    %c0_1 = arith.constant 0 : index
    %c0_2 = arith.constant 0 : index
    %6 = vector.load %arg2[%c0_1, %c0_2] : memref<8x256xf32, #tpu.memory_space<vmem>>, vector<8x256xf32>
    tpu.vector_store %arg2[%c0_1, %c0_2], %5 {strides = array<i32>} : memref<8x256xf32, #tpu.memory_space<vmem>>, vector<8x256xf32>,
    return
  }
  func.func @transform_0(%arg0: i32) -> (i32, i32) {
    %c0_i32 = arith.constant 0 : i32
    %c0_i32_0 = arith.constant 0 : i32
    return %arg0, %c0_i32 : i32, i32
  }
  func.func @transform_1(%arg0: i32) -> (i32, i32) {
    %c0_i32 = arith.constant 0 : i32
    %c0_i32_0 = arith.constant 0 : i32
    return %arg0, %c0_i32 : i32, i32
  }
}

</mosaic_0001>

<bundles_post_ra>
// kernel: tpu_custom_call.1
= control target key start
LH: loop header
LB: loop body
LE: loop exit
PB: predicated region body
PF: predicated region fallthrough
CT: control target
= control target key end

     0   :  { %6 = vsyncpa [#allocation3], 0  ;;  %s148_s0 = inlined_call_operand.hbm [shape: f32[8,256], index: 0, kind: input, shape index: {}]   ;;  %s149_s1 = inlined_call_operand.hbm [shape: f32[8,256], index: 1, kind: output, shape index: {}]  }
   0x1   :  { %7 = vsyncpa [#allocation4], 0  ;;  %s112_s6 = smov [#allocation2]   ;;  %s64_s10 = scalar_lea.hbm %s148_s0, 256 }
   0x2   :  { %s14_s7 = sshll.u32 %s112_s6, 4  ;;  %p65_p0 = scmp.ne.s32.totalorder %s148_s0, %s64_s10  ;;  %s15_s7 = int_to_ptr.vmem [resolvable:$true] %s14_s7 }
   0x3   :  { %p68_p1 = scmp.lt.u32.totalorder %s64_s10, %s148_s0 }
   0x5   :  { %p70_p2 = pnand %p68_p1, %p65_p0 }
   0x7   :  { %73 = shalt.err (!%p70_p2)
}
   0x8   :  { %s74_s15 = scalar_lea.vmem %s15_s7, 256  ;;  %p79_p4 = scmp.lt.s32.totalorder %s15_s7, %s15_s7 }
   0x9   :  { %p75_p3 = scmp.ne.s32.totalorder %s15_s7, %s74_s15  ;;  %p80_p5 = scmp.lt.s32.totalorder %s74_s15, %s74_s15 }
   0xb   :  { %p81_p6 = por %p80_p5, %p79_p4 }
   0xd   :  { %p82_p7 = pnand %p81_p6, %p75_p3 }
   0xf   :  { %85 = shalt.err (!%p82_p7)
}
  0x10   :  { %17 = dma.hbm_to_vmem [thread:$0]  %s148_s0, 256, %s15_s7, [#allocation3]  }
  0x11   :  { %108 = dma.done.wait [#allocation3], 256  }
  0x12   :  { %109 = vsyncadd [#allocation3], 4294967040  ;;  %v21_v0 = vld [vmem:[#allocation2] sm:$0xff]  ;;  %v22_v1 = vld [vmem:[#allocation2 + $0x8] sm:$0xff]  ;;  %s113_s18 = smov [#allocation5]  }
  0x13   :  { %v52_v2 = vmul.f32 -1.442695, %v21_v0  ;;  %v53_v3 = vmul.f32 -1.442695, %v22_v1  ;;  %s43_s19 = sshll.u32 %s113_s18, 4  ;;  %s44_s19 = int_to_ptr.vmem [resolvable:$true] %s43_s19 }
  0x14   :  { %s86_s0 = scalar_lea.vmem %s44_s19, 256  ;;  %p91_p9 = scmp.lt.s32.totalorder %s44_s19, %s44_s19 }
  0x15   :  { %56 = vpow2.f32 %v52_v2  ;;  %p87_p8 = scmp.ne.s32.totalorder %s44_s19, %s86_s0  ;;  %p92_p10 = scmp.lt.s32.totalorder %s86_s0, %s86_s0 }
  0x16   :  { %58 = vpow2.f32 %v53_v3 }
  0x17   :  { %p93_p11 = por %p92_p10, %p91_p9 }
  0x19   :  { %p94_p12 = pnand %p93_p11, %p87_p8 }
  0x1f   :  { %v57_v4 = vpop.eup %56 }
  0x20   :  { %v59_v5 = vpop.eup %58  ;;  %v29_v6 = vadd.f32 1.0, %v57_v4 }
  0x21   :  { %v30_v7 = vadd.f32 1.0, %v59_v5 }
  0x22   :  { %60 = vrcp.f32 %v29_v6 }
  0x23   :  { %62 = vrcp.f32 %v30_v7 }
  0x2c   :  { %v61_v8 = vpop.eup %60 }
  0x2d   :  { %v63_v9 = vpop.eup %62  ;;  %35 = vst [vmem:[#allocation5] sm:$0xff] %v61_v8 }
  0x2e   :  { %36 = vst [vmem:[#allocation5 + $0x8] sm:$0xff] %v63_v9 }
  0x2f   :  { %97 = shalt.err (!%p94_p12)
}
  0x30   :  { %s98_s22 = scalar_lea.hbm %s149_s1, 256 }
  0x31   :  { %p99_p13 = scmp.ne.s32.totalorder %s149_s1, %s98_s22  ;;  %p102_p0 = scmp.lt.u32.totalorder %s98_s22, %s149_s1 }
  0x33   :  { %p104_p1 = pnand %p102_p0, %p99_p13 }
  0x35   :  { %107 = shalt.err (!%p104_p1)
}
  0x36   :  { %46 = dma.vmem_to_hbm [thread:$0]  %s44_s19, 256, %s149_s1, [#allocation4]  }
  0x37   :  { %110 = dma.done.wait [#allocation4], 256  }
  0x38   :  { %111 = vsyncadd [#allocation4], 4294967040 }
  0x39   :  { %50 = vsyncpa [#allocation3], 1 }
  0x3a   :  { %51 = vsyncpa [#allocation4], 1 }

</bundles_post_ra>
